<compile_context>
chip_gen: v7x
topology: tpu7x:2x2x1
jax: 0.10.0
libtpu: 0.0.40
codegen_flags: <defaults>
</compile_context>

<pallas_src>
import jax
import jax.numpy as jnp
from jax.experimental import pallas as pl
from jax.experimental.pallas import tpu as pltpu

# Model hyperparameters (small, consistent with MLPActor(obs_dim, act_dim, ...))
OBS_DIM = 16
ACT_DIM = 8
HIDDEN_SIZES = (32, 32)
ACT_LIMIT = 2.0

LANE = 128         # TPU lane width; hidden feature dims are padded to this.
MAX_TILE_B = 512   # upper bound on batch rows per grid step.
MIN_TILE_B = 128   # don't shrink tiles below this when splitting for megacore.
TARGET_STEPS = 4   # aim for >= this many grid steps at large batch (v7x: 2 TCs).


def _round_up(x, m):
    return ((x + m - 1) // m) * m


def _choose_tile_b(batch):
    if batch <= MIN_TILE_B:
        # Single block covering the whole (small) batch: block dim == array
        # dim, so it is legal even when not a multiple of 8.
        return batch
    tile = _round_up(pl.cdiv(batch, TARGET_STEPS), 8)
    return max(MIN_TILE_B, min(MAX_TILE_B, tile))


def _mlp_actor_kernel(obs_ref, w1_ref, w2_ref, w3_ref, b12_ref, b3_ref, out_ref):
    # obs_ref: (T, OBS_DIM)     w1_ref: (OBS_DIM, 128)   w2_ref: (128, 128)
    # w3_ref:  (128, ACT_DIM)   b12_ref: (2, 128)        b3_ref: (1, ACT_DIM)
    # out_ref: (T, ACT_DIM)
    obs = obs_ref[...]

    # Hidden layer 1: Linear + ReLU (lane-dense 128-wide padded hidden).
    h = jnp.dot(obs, w1_ref[...], preferred_element_type=jnp.float32)
    h = jnp.maximum(h + b12_ref[0:1, :], 0.0)

    # Hidden layer 2: Linear + ReLU.
    h = jnp.dot(h, w2_ref[...], preferred_element_type=jnp.float32)
    h = jnp.maximum(h + b12_ref[1:2, :], 0.0)

    # Output layer: Linear + Tanh, scaled by act_limit.  Only the real
    # ACT_DIM columns are computed and stored (narrow HBM writeback).
    a = jnp.dot(h, w3_ref[...], preferred_element_type=jnp.float32) + b3_ref[...]
    out_ref[...] = (ACT_LIMIT * jnp.tanh(a)).astype(out_ref.dtype)


def mlp_actor_forward(obs, packed):
    """obs: (batch, OBS_DIM) f32; packed: dict from pack_params()."""
    batch = obs.shape[0]
    tile_b = _choose_tile_b(batch)
    grid = (pl.cdiv(batch, tile_b),)

    # Advisory cost hint: tiny kernel, tell XLA the truth so it can schedule
    # around it.
    n_weight_elems = (OBS_DIM * LANE + LANE * LANE + LANE * ACT_DIM
                      + 2 * LANE + ACT_DIM)
    cost = pl.CostEstimate(
        flops=2 * batch * (OBS_DIM * LANE + LANE * LANE + LANE * ACT_DIM),
        transcendentals=batch * ACT_DIM,
        bytes_accessed=4 * (batch * (OBS_DIM + ACT_DIM) + n_weight_elems),
    )

    return pl.pallas_call(
        _mlp_actor_kernel,
        out_shape=jax.ShapeDtypeStruct((batch, ACT_DIM), jnp.float32),
        grid=grid,
        in_specs=[
            # obs: tiled along the batch axis; ragged last block is fine
            # (OOB rows only feed masked-out output rows).
            pl.BlockSpec((tile_b, OBS_DIM), lambda i: (i, 0)),
            # Weights / biases: constant index_map -> revisited-constant
            # blocks, DMA'd once and VMEM-resident across all grid steps.
            pl.BlockSpec((OBS_DIM, LANE), lambda i: (0, 0)),
            pl.BlockSpec((LANE, LANE), lambda i: (0, 0)),
            pl.BlockSpec((LANE, ACT_DIM), lambda i: (0, 0)),
            pl.BlockSpec((2, LANE), lambda i: (0, 0)),
            pl.BlockSpec((1, ACT_DIM), lambda i: (0, 0)),
        ],
        out_specs=pl.BlockSpec((tile_b, ACT_DIM), lambda i: (i, 0)),
        compiler_params=pltpu.CompilerParams(
            dimension_semantics=("parallel",)),
        cost_estimate=cost,
    )(obs, packed["W1"], packed["W2"], packed["W3"], packed["B12"], packed["B3"])


def init_params(key):
    """Deterministic synthetic init (uniform, PyTorch nn.Linear-style bounds)."""
    sizes = [OBS_DIM] + list(HIDDEN_SIZES) + [ACT_DIM]
    keys = jax.random.split(key, 2 * (len(sizes) - 1))
    params = {}
    for j in range(len(sizes) - 1):
        fan_in, fan_out = sizes[j], sizes[j + 1]
        bound = 1.0 / (fan_in ** 0.5)
        params[f"W{j+1}"] = jax.random.uniform(
            keys[2 * j], (fan_in, fan_out), jnp.float32, -bound, bound)
        params[f"b{j+1}"] = jax.random.uniform(
            keys[2 * j + 1], (fan_out,), jnp.float32, -bound, bound)
    return params


def pack_params(params):
    """Zero-pad hidden dims to 128 lanes; keep the output dim at ACT_DIM."""
    h1, h2 = HIDDEN_SIZES
    w1 = jnp.zeros((OBS_DIM, LANE), jnp.float32).at[:, :h1].set(params["W1"])
    w2 = jnp.zeros((LANE, LANE), jnp.float32).at[:h1, :h2].set(params["W2"])
    w3 = jnp.zeros((LANE, ACT_DIM), jnp.float32).at[:h2, :].set(params["W3"])
    b12 = jnp.zeros((2, LANE), jnp.float32)
    b12 = b12.at[0, :h1].set(params["b1"])
    b12 = b12.at[1, :h2].set(params["b2"])
    b3 = params["b3"].reshape(1, ACT_DIM)
    return {"W1": w1, "W2": w2, "W3": w3, "B12": b12, "B3": b3}


def reference_forward(obs, params):
    h = jnp.maximum(obs @ params["W1"] + params["b1"], 0.0)
    h = jnp.maximum(h @ params["W2"] + params["b2"], 0.0)
    return ACT_LIMIT * jnp.tanh(h @ params["W3"] + params["b3"])


if __name__ == "__main__":
    key = jax.random.PRNGKey(0)
    k_obs, k_params, k_obs2 = jax.random.split(key, 3)

    params = init_params(k_params)
    packed = pack_params(params)

    fwd = jax.jit(mlp_actor_forward)

    # Small batch: single grid step, block dim == batch dim.
    obs = jax.random.normal(k_obs, (8, OBS_DIM), jnp.float32)
    out = jax.block_until_ready(fwd(obs, packed))
    ref = reference_forward(obs, params)
    assert out.shape == (8, ACT_DIM)
    assert jnp.allclose(out, ref, atol=1e-5, rtol=1e-5)

    # Larger batch: exercises the batch grid (2 steps), resident weights, and
    # the ragged (masked) last block without any jnp.pad.
    obs2 = jax.random.normal(k_obs2, (200, OBS_DIM), jnp.float32)
    out2 = jax.block_until_ready(fwd(obs2, packed))
    ref2 = reference_forward(obs2, params)
    assert out2.shape == (200, ACT_DIM)
    assert jnp.allclose(out2, ref2, atol=1e-5, rtol=1e-5)

    print("KERNEL_OK")
</pallas_src>

<mosaic_0001>
module attributes {stable_mosaic.version = 11 : i64} {
  func.func @_mlp_actor_kernel(%arg0: i32, %arg1: memref<8x16xf32, #tpu.memory_space<vmem>>, %arg2: memref<16x128xf32, #tpu.memory_space<vmem>>, %arg3: memref<128x128xf32, #tpu.memory_space<vmem>>, %arg4: memref<128x8xf32, #tpu.memory_space<vmem>>, %arg5: memref<2x128xf32, #tpu.memory_space<vmem>>, %arg6: memref<1x8xf32, #tpu.memory_space<vmem>>, %arg7: memref<8x8xf32, #tpu.memory_space<vmem>>) attributes {dimension_semantics = [#tpu.dimension_semantics<parallel>], iteration_bounds = array<i64: 1>, scalar_prefetch = 0 : i64, scratch_operands = 0 : i64, tpu.core_type = #tpu.core_type<tc>, window_params = [{transform_indices = @transform_0, window_bounds = array<i64: 8, 16>}, {pipeline_mode = #tpu.pipeline_mode<synchronous>, transform_indices = @transform_1, window_bounds = array<i64: 16, 128>}, {pipeline_mode = #tpu.pipeline_mode<synchronous>, transform_indices = @transform_2, window_bounds = array<i64: 128, 128>}, {pipeline_mode = #tpu.pipeline_mode<synchronous>, transform_indices = @transform_3, window_bounds = array<i64: 128, 8>}, {pipeline_mode = #tpu.pipeline_mode<synchronous>, transform_indices = @transform_4, window_bounds = array<i64: 2, 128>}, {pipeline_mode = #tpu.pipeline_mode<synchronous>, transform_indices = @transform_5, window_bounds = array<i64: 1, 8>}, {transform_indices = @transform_6, window_bounds = array<i64: 8, 8>}]} {
    %c0 = arith.constant 0 : index
    %c0_0 = arith.constant 0 : index
    %0 = vector.load %arg1[%c0, %c0_0] : memref<8x16xf32, #tpu.memory_space<vmem>>, vector<8x16xf32>
    %c0_1 = arith.constant 0 : index
    %c0_2 = arith.constant 0 : index
    %1 = vector.load %arg2[%c0_1, %c0_2] : memref<16x128xf32, #tpu.memory_space<vmem>>, vector<16x128xf32>
    %cst = arith.constant dense<0.000000e+00> : vector<8x128xf32>
    %2 = tpu.matmul %0, %1, %cst {dimension_numbers = #tpu.dot_dimension_numbers<[1], [0], [0], [1], [0, 0, 1, 1], [], []>} : vector<8x16xf32>, vector<16x128xf32>, vector<8x128xf32> -> vector<8x128xf32>
    %c0_3 = arith.constant 0 : index
    %c0_4 = arith.constant 0 : index
    %3 = vector.load %arg5[%c0_3, %c0_4] : memref<2x128xf32, #tpu.memory_space<vmem>>, vector<1x128xf32>
    %4 = vector.broadcast %3 : vector<1x128xf32> to vector<8x128xf32>
    %5 = arith.addf %2, %4 : vector<8x128xf32>
    %cst_5 = arith.constant 0.000000e+00 : f32
    %6 = vector.broadcast %cst_5 : f32 to vector<8x128xf32>
    %7 = arith.maximumf %5, %6 : vector<8x128xf32>
    %c0_6 = arith.constant 0 : index
    %c0_7 = arith.constant 0 : index
    %8 = vector.load %arg3[%c0_6, %c0_7] : memref<128x128xf32, #tpu.memory_space<vmem>>, vector<128x128xf32>
    %cst_8 = arith.constant dense<0.000000e+00> : vector<8x128xf32>
    %9 = tpu.matmul %7, %8, %cst_8 {dimension_numbers = #tpu.dot_dimension_numbers<[1], [0], [0], [1], [0, 0, 1, 1], [], []>} : vector<8x128xf32>, vector<128x128xf32>, vector<8x128xf32> -> vector<8x128xf32>
    %c1 = arith.constant 1 : index
    %c0_9 = arith.constant 0 : index
    %10 = vector.load %arg5[%c1, %c0_9] : memref<2x128xf32, #tpu.memory_space<vmem>>, vector<1x128xf32>
    %11 = vector.broadcast %10 : vector<1x128xf32> to vector<8x128xf32>
    %12 = arith.addf %9, %11 : vector<8x128xf32>
    %cst_10 = arith.constant 0.000000e+00 : f32
    %13 = vector.broadcast %cst_10 : f32 to vector<8x128xf32>
    %14 = arith.maximumf %12, %13 : vector<8x128xf32>
    %c0_11 = arith.constant 0 : index
    %c0_12 = arith.constant 0 : index
    %15 = vector.load %arg4[%c0_11, %c0_12] : memref<128x8xf32, #tpu.memory_space<vmem>>, vector<128x8xf32>
    %cst_13 = arith.constant dense<0.000000e+00> : vector<8x8xf32>
    %16 = tpu.matmul %14, %15, %cst_13 {dimension_numbers = #tpu.dot_dimension_numbers<[1], [0], [0], [1], [0, 0, 1, 1], [], []>} : vector<8x128xf32>, vector<128x8xf32>, vector<8x8xf32> -> vector<8x8xf32>
    %c0_14 = arith.constant 0 : index
    %c0_15 = arith.constant 0 : index
    %17 = vector.load %arg6[%c0_14, %c0_15] : memref<1x8xf32, #tpu.memory_space<vmem>>, vector<1x8xf32>
    %18 = vector.broadcast %17 : vector<1x8xf32> to vector<8x8xf32>
    %19 = arith.addf %16, %18 : vector<8x8xf32>
    %20 = math.tanh %19 : vector<8x8xf32>
    %cst_16 = arith.constant 2.000000e+00 : f32
    %21 = vector.broadcast %cst_16 : f32 to vector<8x8xf32>
    %22 = arith.mulf %21, %20 : vector<8x8xf32>
    %c0_17 = arith.constant 0 : index
    %c0_18 = arith.constant 0 : index
    %23 = vector.load %arg7[%c0_17, %c0_18] : memref<8x8xf32, #tpu.memory_space<vmem>>, vector<8x8xf32>
    tpu.vector_store %arg7[%c0_17, %c0_18], %22 {strides = array<i32>} : memref<8x8xf32, #tpu.memory_space<vmem>>, vector<8x8xf32>,
    return
  }
  func.func @transform_0(%arg0: i32) -> (i32, i32) {
    %c0_i32 = arith.constant 0 : i32
    %c0_i32_0 = arith.constant 0 : i32
    return %arg0, %c0_i32 : i32, i32
  }
  func.func @transform_1(%arg0: i32) -> (i32, i32) {
    %c0_i32 = arith.constant 0 : i32
    %c0_i32_0 = arith.constant 0 : i32
    %c0_i32_1 = arith.constant 0 : i32
    return %c0_i32, %c0_i32_0 : i32, i32
  }
  func.func @transform_2(%arg0: i32) -> (i32, i32) {
    %c0_i32 = arith.constant 0 : i32
    %c0_i32_0 = arith.constant 0 : i32
    %c0_i32_1 = arith.constant 0 : i32
    return %c0_i32, %c0_i32_0 : i32, i32
  }
  func.func @transform_3(%arg0: i32) -> (i32, i32) {
    %c0_i32 = arith.constant 0 : i32
    %c0_i32_0 = arith.constant 0 : i32
    %c0_i32_1 = arith.constant 0 : i32
    return %c0_i32, %c0_i32_0 : i32, i32
  }
  func.func @transform_4(%arg0: i32) -> (i32, i32) {
    %c0_i32 = arith.constant 0 : i32
    %c0_i32_0 = arith.constant 0 : i32
    %c0_i32_1 = arith.constant 0 : i32
    return %c0_i32, %c0_i32_0 : i32, i32
  }
  func.func @transform_5(%arg0: i32) -> (i32, i32) {
    %c0_i32 = arith.constant 0 : i32
    %c0_i32_0 = arith.constant 0 : i32
    %c0_i32_1 = arith.constant 0 : i32
    return %c0_i32, %c0_i32_0 : i32, i32
  }
  func.func @transform_6(%arg0: i32) -> (i32, i32) {
    %c0_i32 = arith.constant 0 : i32
    %c0_i32_0 = arith.constant 0 : i32
    return %arg0, %c0_i32 : i32, i32
  }
}

</mosaic_0001>

<bundles_post_ra>
// kernel: mlp_actor_forward.1
= control target key start
LH: loop header
LB: loop body
LE: loop exit
PB: predicated region body
PF: predicated region fallthrough
CT: control target
= control target key end

     0   :  { %11 = vsyncpa [#allocation3], 0  ;;  %s790_s0 = inlined_call_operand.hbm [shape: f32[8,16], index: 0, kind: input, shape index: {}]   ;;  %s791_s1 = inlined_call_operand.vmem [shape: f32[16,128], index: 1, kind: input, shape index: {}]   ;;  %s792_s2 = inlined_call_operand.vmem [shape: f32[128,128], index: 2, kind: input, shape index: {}]   ;;  %s793_s3 = inlined_call_operand.vmem [shape: f32[128,8], index: 3, kind: input, shape index: {}]   ;;  %s794_s4 = inlined_call_operand.vmem [shape: f32[2,128], index: 4, kind: input, shape index: {}]   ;;  %s795_s5 = inlined_call_operand.hbm [shape: f32[1,8], index: 5, kind: input, shape index: {}]   ;;  %s796_s6 = inlined_call_operand.hbm [shape: f32[8,8], index: 6, kind: output, shape index: {}]  }
   0x1   :  { %12 = vsyncpa [#allocation6], 0 }
   0x2   :  { %13 = vsyncpa [#allocation4], 0  ;;  %s585_s21 = smov [#allocation2]   ;;  %s586_s23 = smov [#allocation5]  }
   0x3   :  { %s20_s22 = sshll.u32 %s585_s21, 4  ;;  %s38_s24 = sshll.u32 %s586_s23, 4  ;;  %s21_s22 = int_to_ptr.vmem [resolvable:$true] %s20_s22  ;;  %s39_s24 = int_to_ptr.vmem [resolvable:$true] %s38_s24 }
   0x4   :  { %s513_s27 = scalar_lea.hbm %s790_s0, 128 }
   0x5   :  { %p514_p0 = scmp.ne.s32.totalorder %s790_s0, %s513_s27  ;;  %p517_p1 = scmp.lt.u32.totalorder %s513_s27, %s790_s0 }
   0x7   :  { %p519_p2 = pnand %p517_p1, %p514_p0 }
   0x9   :  { %522 = shalt.err (!%p519_p2)
}
   0xa   :  { %s523_s8 = scalar_lea.vmem %s21_s22, 128  ;;  %p528_p4 = scmp.lt.s32.totalorder %s21_s22, %s21_s22 }
   0xb   :  { %p524_p3 = scmp.ne.s32.totalorder %s21_s22, %s523_s8  ;;  %p529_p5 = scmp.lt.s32.totalorder %s523_s8, %s523_s8 }
   0xd   :  { %p530_p6 = por %p529_p5, %p528_p4 }
   0xf   :  { %p531_p7 = pnand %p530_p6, %p524_p3 }
  0x11   :  { %534 = shalt.err (!%p531_p7)
}
  0x12   :  { %23 = dma.hbm_to_vmem [thread:$0]  %s790_s0, 128, %s21_s22, [#allocation3]  }
  0x13   :  { %s535_s13 = scalar_lea.hbm %s795_s5, 16 }
  0x14   :  { %p536_p8 = scmp.ne.s32.totalorder %s795_s5, %s535_s13  ;;  %p539_p9 = scmp.lt.u32.totalorder %s535_s13, %s795_s5 }
  0x16   :  { %p541_p10 = pnand %p539_p9, %p536_p8 }
  0x18   :  { %544 = shalt.err (!%p541_p10)
}
  0x19   :  { %s545_s18 = scalar_lea.vmem %s39_s24, 16  ;;  %s549_s19 = scalar_lea.vmem %s39_s24, 32 }
  0x1a   :  { %p546_p11 = scmp.ne.s32.totalorder %s39_s24, %s545_s18  ;;  %p550_p12 = scmp.lt.s32.totalorder %s39_s24, %s39_s24 }
  0x1b   :  { %p551_p13 = scmp.lt.s32.totalorder %s549_s19, %s545_s18 }
  0x1d   :  { %p552_p0 = por %p551_p13, %p550_p12 }
  0x1f   :  { %p553_p1 = pnand %p552_p0, %p546_p11 }
  0x21   :  { %556 = shalt.err (!%p553_p1)
}
  0x22   :  { %41 = dma.hbm_to_vmem [thread:$0]  %s795_s5, 16, %s39_s24, [#allocation6]  }
  0x23   :  { %579 = dma.done.wait [#allocation3], 128  }
  0x24   :  { %580 = vsyncadd [#allocation3], 4294967168 }
  0x25   :  { %581 = dma.done.wait [#allocation6], 16  }
  0x26   :  { %582 = vsyncadd [#allocation6], 4294967280  ;;  %v587_v0 = vmov 0.0|0.0   ;;  %vm588_vm0 = vmmov 0   ;;  %v589_v1 = vmov 0.0   ;;  %v49_v2 = vld [vmem:[%s791_s1] sm:$0xff] }
  0x27   :  { %454 = vmatprep.subr.bf16.mxu0 %v587_v0  ;;  %381 = vmatprep.mubr.msk.f32.mxu0 %vm588_vm0, %v589_v1  ;;  %v50_v3 = vld [vmem:[%s791_s1 + $0x8] sm:$0xff]  ;;  %v131_v5 = vld [vmem:[%s792_s2] sm:$0xff]  ;;  %v133_v7 = vld [vmem:[%s792_s2 + $0x10] sm:$0xff]  ;;  %vm56_vm1 = vcmask 130048   ;;  %vm318_vm2 = vcmask 64512  }
  0x28   :  { %457 = vmatprep.subr.bf16.mxu1 %v587_v0  ;;  %416 = vmatprep.mubr.msk.f32.mxu1 %vm588_vm0, %v589_v1  ;;  %v455_v4 = vpack.c.bf16 %v50_v3, %v49_v2  ;;  %v132_v6 = vld [vmem:[%s792_s2 + $0x8] sm:$0xff]  ;;  %v134_v9 = vld [vmem:[%s792_s2 + $0x18] sm:$0xff]  ;;  %v48_v10 = vld [vmem:[#allocation2] sm:$0xff] }
  0x29   :  { %v458_v8 = vpack.c.bf16 %v132_v6, %v131_v5  ;;  %v461_v11 = vpack.c.bf16 %v134_v9, %v133_v7  ;;  %v135_v12 = vld [vmem:[%s792_s2 + $0x20] sm:$0xff]  ;;  %v136_v13 = vld [vmem:[%s792_s2 + $0x28] sm:$0xff]  ;;  %v137_v15 = vld [vmem:[%s792_s2 + $0x30] sm:$0xff] }
  0x2a   :  { %456 = vmatpush3.bf16.msra.mxu0 %v455_v4  ;;  %v464_v14 = vpack.c.bf16 %v136_v13, %v135_v12  ;;  %v138_v16 = vld [vmem:[%s792_s2 + $0x38] sm:$0xff]  ;;  %v139_v18 = vld [vmem:[%s792_s2 + $0x40] sm:$0xff]  ;;  %v140_v19 = vld [vmem:[%s792_s2 + $0x48] sm:$0xff] }
  0x2b   :  { %459 = vmatpush3.bf16.msra.mxu1 %v458_v8  ;;  %481 = vmatprep.subr.bf16.mxu0 %v587_v0  ;;  %v467_v17 = vpack.c.bf16 %v138_v16, %v137_v15  ;;  %v470_v20 = vpack.c.bf16 %v140_v19, %v139_v18  ;;  %v141_v21 = vld [vmem:[%s792_s2 + $0x50] sm:$0xff]  ;;  %v142_v22 = vld [vmem:[%s792_s2 + $0x58] sm:$0xff]  ;;  %v143_v24 = vld [vmem:[%s792_s2 + $0x60] sm:$0xff] }
  0x2c   :  { %460 = vmatprep.subr.bf16.mxu1 %v587_v0  ;;  %v473_v23 = vpack.c.bf16 %v142_v22, %v141_v21  ;;  %v144_v25 = vld [vmem:[%s792_s2 + $0x68] sm:$0xff]  ;;  %v145_v27 = vld [vmem:[%s792_s2 + $0x70] sm:$0xff]  ;;  %v146_v28 = vld [vmem:[%s792_s2 + $0x78] sm:$0xff]  ;;  %s590_s2 = smov [#allocation7]  }
  0x2d   :  { %382 = vmatmul.mubr.msk.f32.vlgmr.msra.gmra.mrb[0].mxu0 %vm56_vm1, %v48_v10  ;;  %v476_v26 = vpack.c.bf16 %v144_v25, %v143_v24  ;;  %v479_v29 = vpack.c.bf16 %v146_v28, %v145_v27  ;;  %v223_v30 = vld [vmem:[%s793_s3] sm:$0xff]  ;;  %v224_v31 = vld [vmem:[%s793_s3 + $0x8] sm:$0xff]  ;;  %v225_v32 = vld [vmem:[%s793_s3 + $0x10] sm:$0xff]  ;;  %s326_s12 = sshll.u32 %s590_s2, 4  ;;  %s327_s12 = int_to_ptr.vmem [resolvable:$true] %s326_s12 }
  0x2e   :  { %451 = vmatprep.mubr.msk.f32.mxu0 %vm588_vm0, %v589_v1  ;;  %v482_v33 = vpack.c.bf16 %v224_v31, %v223_v30  ;;  %v226_v34 = vld [vmem:[%s793_s3 + $0x18] sm:$0xff]  ;;  %v227_v36 = vld [vmem:[%s793_s3 + $0x20] sm:$0xff]  ;;  %v228_v37 = vld [vmem:[%s793_s3 + $0x28] sm:$0xff]  ;;  %p562_p3 = scmp.lt.s32.totalorder %s327_s12, %s327_s12 }
  0x2f   :  { %462 = vmatpush3.bf16.msra.mxu1 %v461_v11  ;;  %v485_v35 = vpack.c.bf16 %v226_v34, %v225_v32  ;;  %v488_v38 = vpack.c.bf16 %v228_v37, %v227_v36  ;;  %v229_v39 = vld [vmem:[%s793_s3 + $0x30] sm:$0xff]  ;;  %v230_v40 = vld [vmem:[%s793_s3 + $0x38] sm:$0xff]  ;;  %v231_v42 = vld [vmem:[%s793_s3 + $0x40] sm:$0xff] }
  0x30   :  { %463 = vmatprep.subr.bf16.mxu1 %v587_v0  ;;  %483 = vmatpush3.bf16.msra.mxu0 %v482_v33  ;;  %v491_v41 = vpack.c.bf16 %v230_v40, %v229_v39  ;;  %v232_v43 = vld [vmem:[%s793_s3 + $0x48] sm:$0xff]  ;;  %v233_v45 = vld [vmem:[%s793_s3 + $0x50] sm:$0xff]  ;;  %v234_v46 = vld [vmem:[%s793_s3 + $0x58] sm:$0xff] }
  0x31   :  { %484 = vmatprep.subr.bf16.mxu0 %v587_v0  ;;  %v494_v44 = vpack.c.bf16 %v232_v43, %v231_v42  ;;  %v497_v47 = vpack.c.bf16 %v234_v46, %v233_v45  ;;  %v235_v48 = vld [vmem:[%s793_s3 + $0x60] sm:$0xff]  ;;  %v236_v49 = vld [vmem:[%s793_s3 + $0x68] sm:$0xff]  ;;  %v237_v56 = vld [vmem:[%s793_s3 + $0x70] sm:$0xff] }
  0x32   :  { %v500_v50 = vpack.c.bf16 %v236_v49, %v235_v48  ;;  %v336_v51 = vld [vmem:[%s794_s4] ss:$0 sm:$0xff]  ;;  %v238_v57 = vld [vmem:[%s793_s3 + $0x78] sm:$0xff]  ;;  %v338_v59 = vld [vmem:[%s794_s4 + $0x1] ss:$0 sm:$0xff]  ;;  %s557_s3 = scalar_lea.vmem %s327_s12, 128 }
  0x33   :  { %465 = vmatpush3.bf16.msra.mxu1 %v464_v14  ;;  %v503_v58 = vpack.c.bf16 %v238_v57, %v237_v56  ;;  %p558_p2 = scmp.ne.s32.totalorder %s327_s12, %s557_s3  ;;  %p563_p4 = scmp.lt.s32.totalorder %s557_s3, %s557_s3 }
  0x34   :  { %466 = vmatprep.subr.bf16.mxu1 %v587_v0  ;;  %486 = vmatpush3.bf16.msra.mxu0 %v485_v35 }
  0x35   :  { %487 = vmatprep.subr.bf16.mxu0 %v587_v0  ;;  %p564_p5 = por %p563_p4, %p562_p3 }
  0x37   :  { %468 = vmatpush3.bf16.msra.mxu1 %v467_v17  ;;  %p565_p6 = pnand %p564_p5, %p558_p2 }
  0x38   :  { %469 = vmatprep.subr.bf16.mxu1 %v587_v0  ;;  %489 = vmatpush3.bf16.msra.mxu0 %v488_v38 }
  0x39   :  { %490 = vmatprep.subr.bf16.mxu0 %v587_v0 }
  0x3b   :  { %471 = vmatpush3.bf16.msra.mxu1 %v470_v20 }
  0x3c   :  { %472 = vmatprep.subr.bf16.mxu1 %v587_v0  ;;  %492 = vmatpush3.bf16.msra.mxu0 %v491_v41 }
  0x3d   :  { %493 = vmatprep.subr.bf16.mxu0 %v587_v0 }
  0x3f   :  { %474 = vmatpush3.bf16.msra.mxu1 %v473_v23 }
  0x40   :  { %475 = vmatprep.subr.bf16.mxu1 %v587_v0  ;;  %495 = vmatpush3.bf16.msra.mxu0 %v494_v44 }
  0x41   :  { %496 = vmatprep.subr.bf16.mxu0 %v587_v0 }
  0x43   :  { %477 = vmatpush3.bf16.msra.mxu1 %v476_v26 }
  0x44   :  { %478 = vmatprep.subr.bf16.mxu1 %v587_v0  ;;  %498 = vmatpush3.bf16.msra.mxu0 %v497_v47 }
  0x45   :  { %499 = vmatprep.subr.bf16.mxu0 %v587_v0 }
  0x47   :  { %480 = vmatpush3.bf16.msra.mxu1 %v479_v29 }
  0x48   :  { %501 = vmatpush3.bf16.msra.mxu0 %v500_v50 }
  0x49   :  { %502 = vmatprep.subr.bf16.mxu0 %v587_v0  ;;  %v339_v0 = vld [vmem:[#allocation5] ss:$0 sm:$0xff] }
  0x4c   :  { %504 = vmatpush3.bf16.msra.mxu0 %v503_v58 }
 0x100   :  { %v126_v52 = vpop.f32.mrb[0].mxu0 }
 0x101   :  { %v127_v53 = vadd.f32 %v336_v51, %v126_v52  ;;  %v383_v54 = vpop.f32.mrb[1].mxu0 }
 0x103   :  { %v130_v55 = vmax.f32 %v127_v53, 0.0 }
 0x105   :  { %417 = vmatmul.mubr.f32.vlgmr.msra.gmra.mrb[0].mxu1 %v130_v55 }
 0x1d8   :  { %v218_v60 = vpop.f32.mrb[0].mxu1 }
 0x1d9   :  { %v219_v61 = vadd.f32 %v338_v59, %v218_v60  ;;  %v418_v62 = vpop.f32.mrb[1].mxu1 }
 0x1db   :  { %v222_v63 = vmax.f32 %v219_v61, 0.0 }
 0x1dd   :  { %452 = vmatmul.mubr.f32.vlgmr.msra.gmra.mrb[2].mxu0 %v222_v63 }
 0x2b0   :  { %v312_v1 = vpop.f32.mrb[2].mxu0 }
 0x2b1   :  { %v313_v2 = vadd.f32 %v339_v0, %v312_v1  ;;  %v453_v3 = vpop.f32.mrb[3].mxu0 }
 0x2b3   :  { %511 = vtanh.f32 %v313_v2 }
 0x2bd   :  { %v512_v4 = vpop.eup %511 }
 0x2be   :  { %v317_v5 = vmul.f32 2.0, %v512_v4 }
 0x2c0   :  { %319 = vst.msk [vmem:[#allocation7] sm:$0xff] %vm318_vm2, %v317_v5 }
 0x2c1   :  { %568 = shalt.err (!%p565_p6)
}
 0x2c2   :  { %s569_s14 = scalar_lea.hbm %s796_s6, 128 }
 0x2c3   :  { %p570_p7 = scmp.ne.s32.totalorder %s796_s6, %s569_s14  ;;  %p573_p8 = scmp.lt.u32.totalorder %s569_s14, %s796_s6 }
 0x2c5   :  { %p575_p9 = pnand %p573_p8, %p570_p7 }
 0x2c7   :  { %578 = shalt.err (!%p575_p9)
}
 0x2c8   :  { %329 = dma.vmem_to_hbm [thread:$0]  %s327_s12, 128, %s796_s6, [#allocation4]  }
 0x2c9   :  { %583 = dma.done.wait [#allocation4], 128  }
 0x2ca   :  { %584 = vsyncadd [#allocation4], 4294967168 }
 0x2cb   :  { %333 = vsyncpa [#allocation3], 1 }
 0x2cc   :  { %334 = vsyncpa [#allocation6], 1 }
 0x2cd   :  { %335 = vsyncpa [#allocation4], 1 }

</bundles_post_ra>
